<compile_context>
chip_gen: v5e
topology: v5e:2x2
jax: 0.10.0
libtpu: 0.0.40
codegen_flags: <defaults>
</compile_context>

<pallas_src>
import jax
import jax.numpy as jnp
from jax.experimental import pallas as pl
from jax.experimental.pallas import tpu as pltpu


def scene_graph_mlp_kernel(
    idx_ref,                   # [TE, 2]  int32  (src, dst) object index per edge
    p1_ref, p2_ref,            # [N_PAD, 128] bf16  hoisted layer-1 partials
    b1_ref,                    # [1, 128] f32
    w2, b2, w3, b3,            # object_fc layers 2-3
    w45, b45,                  # fused object_fc[3] + relation_fc[0]  (32 -> 8)
    w6, b6,                    # relation_fc layer 2 (8 -> 4)
    w7, b7,                    # relation_fc layer 3 (4 -> C_PAD)
    out_ref,                   # [TE, C_PAD] f32
):
    def layer(h, w_ref, b_ref):
        # bf16 x bf16 MXU matmul, f32 accumulation, f32 bias, ReLU, back to bf16.
        y = jnp.dot(h, w_ref[...], preferred_element_type=jnp.float32) + b_ref[...]
        return jnp.maximum(y, 0.0).astype(jnp.bfloat16)

    idx = idx_ref[...]                                    # [TE, 2] int32
    te = idx.shape[0]
    n_pad = p1_ref.shape[0]

    # In-kernel gather of the two endpoint rows via one-hot MXU matmuls (exact
    # row selection).  N_PAD is small for scene graphs, so this is cheap and it
    # removes the x_cat HBM round-trip and the separate XLA gather entirely.
    col = jax.lax.broadcasted_iota(jnp.int32, (te, n_pad), 1)
    oh_src = jnp.where(idx[:, 0:1] == col, 1.0, 0.0).astype(jnp.bfloat16)
    oh_dst = jnp.where(idx[:, 1:2] == col, 1.0, 0.0).astype(jnp.bfloat16)

    # Layer 1 hoisted per object: relu(P1[src] + P2[dst] + b1)  (exact algebra,
    # replaces concat([f1, f2]) @ W1).
    h = (jnp.dot(oh_src, p1_ref[...], preferred_element_type=jnp.float32)
         + jnp.dot(oh_dst, p2_ref[...], preferred_element_type=jnp.float32)
         + b1_ref[...])
    h = jnp.maximum(h, 0.0).astype(jnp.bfloat16)          # [TE, 128]

    h = layer(h, w2, b2)                                  # 128 -> 64
    h = layer(h, w3, b3)                                  # 64  -> 32
    h = layer(h, w45, b45)                                # 32  -> 8   (fused, exact)
    h = layer(h, w6, b6)                                  # 8   -> 4
    out = jnp.dot(h, w7[...], preferred_element_type=jnp.float32) + b7[...]
    out_ref[...] = out.astype(out_ref.dtype)              # narrow [TE, C_PAD] store


def init_linear(key, fan_in, fan_out):
    """PyTorch-style nn.Linear init: U(-1/sqrt(fan_in), 1/sqrt(fan_in)).
    Weight stored as [in, out] (transposed relative to PyTorch)."""
    kw, kb = jax.random.split(key)
    bound = 1.0 / jnp.sqrt(jnp.float32(fan_in))
    w = jax.random.uniform(kw, (fan_in, fan_out), jnp.float32, -bound, bound)
    b = jax.random.uniform(kb, (1, fan_out), jnp.float32, -bound, bound)
    return w, b


def make_params(key, num_relation_classes):
    dims = [(16, 128), (128, 64), (64, 32), (32, 16),      # object_fc
            (16, 8), (8, 4), (4, num_relation_classes)]    # relation_fc
    keys = jax.random.split(key, len(dims))
    params = []
    for k, (fi, fo) in zip(keys, dims):
        params.extend(init_linear(k, fi, fo))
    return params  # flat list: w1, b1, ..., w7, b7


def _round_up(x, m):
    return ((x + m - 1) // m) * m


def scene_graph_forward(object_features, relations, edge_index, params,
                        num_relation_classes, tile_e=2048):
    """Equivalent of SceneGraphModel.forward.

    object_features: [N, 8] float32
    relations      : [E]    (labels, any dtype)
    edge_index     : [2, E] int32
    returns (relation_outputs [E, C] float32, relation_labels [E])
    """
    E = edge_index.shape[1]
    N = object_features.shape[0]
    C = num_relation_classes
    C_PAD = _round_up(C, 8)              # narrow output: C_PAD*4 B/edge writeback
    N_PAD = _round_up(max(N, 1), 8)

    # --- edge tile size -------------------------------------------------------
    e8 = _round_up(max(E, 1), 8)
    TE = min(tile_e, e8)
    # v7x has 2 TensorCores: keep >= 2 grid steps when there is enough work so
    # dimension_semantics=("parallel",) can shard the edge axis across them.
    if TE >= e8 and e8 >= 16:
        TE = _round_up(pl.cdiv(e8, 2), 8)
    # One-hot gather operands are 2 x [TE, N_PAD] bf16; keep them modest.
    # TODO(synk): for very large object counts, switch the in-kernel gather to a
    # DMA / dynamic-gather strategy instead of the one-hot matmul.
    TE = min(TE, max(8, _round_up((1 << 20) // N_PAD, 8)))
    E_PAD = _round_up(E, TE)

    # --- per-edge indices: [E_PAD, 2] int32 (8 B/edge of kernel input) --------
    idx = jnp.pad(edge_index.astype(jnp.int32).T, ((0, E_PAD - E), (0, 0)))

    # --- hoist layer 1 per object: P1 = obj @ W1[:8], P2 = obj @ W1[8:] -------
    ws = params[0::2]
    bs = params[1::2]
    obj = jnp.pad(object_features.astype(jnp.float32), ((0, N_PAD - N), (0, 0)))
    p1 = (obj @ ws[0][:8, :]).astype(jnp.bfloat16)         # [N_PAD, 128]
    p2 = (obj @ ws[0][8:, :]).astype(jnp.bfloat16)         # [N_PAD, 128]

    # --- fuse object_fc[3] (32->16, no ReLU) with relation_fc[0] (16->8) ------
    w45 = ws[3] @ ws[4]                                    # [32, 8]   exact
    b45 = bs[3] @ ws[4] + bs[4]                            # [1, 8]
    # --- pad the classifier to C_PAD output lanes ------------------------------
    w7p = jnp.zeros((ws[6].shape[0], C_PAD), jnp.float32).at[:, :C].set(ws[6])
    b7p = jnp.zeros((1, C_PAD), jnp.float32).at[:, :C].set(bs[6])

    resident = [
        p1, p2, bs[0].astype(jnp.float32),
        ws[1].astype(jnp.bfloat16), bs[1].astype(jnp.float32),
        ws[2].astype(jnp.bfloat16), bs[2].astype(jnp.float32),
        w45.astype(jnp.bfloat16), b45.astype(jnp.float32),
        ws[5].astype(jnp.bfloat16), bs[5].astype(jnp.float32),
        w7p.astype(jnp.bfloat16), b7p.astype(jnp.float32),
    ]

    grid = (E_PAD // TE,)
    # Tables / weights / biases: full-array blocks with constant index_maps so
    # they stay resident in VMEM across all grid steps (no per-step re-DMA).
    resident_specs = [pl.BlockSpec(p.shape, lambda i: (0, 0)) for p in resident]

    out_padded = pl.pallas_call(
        scene_graph_mlp_kernel,
        out_shape=jax.ShapeDtypeStruct((E_PAD, C_PAD), jnp.float32),
        grid=grid,
        in_specs=[pl.BlockSpec((TE, 2), lambda i: (i, 0))] + resident_specs,
        out_specs=pl.BlockSpec((TE, C_PAD), lambda i: (i, 0)),
        compiler_params=pltpu.CompilerParams(
            dimension_semantics=("parallel",),   # megacore-shard the edge axis
        ),
    )(idx, *resident)

    # TODO(synk): if the logits feed a fused consumer (e.g. cross-entropy), hand
    # it the padded [E_PAD, C_PAD] array directly and skip this slice.
    relation_outputs = out_padded[:E, :C]
    # Labels: the PyTorch loop appends relations[i] for i in range(E) -> relations[:E]
    relation_labels = relations[:E]
    return relation_outputs, relation_labels


def reference_forward(object_features, relations, edge_index, params):
    """Pure-JAX f32 reference (unfused, unpadded) for correctness checking."""
    f1 = jnp.take(object_features, edge_index[0], axis=0)
    f2 = jnp.take(object_features, edge_index[1], axis=0)
    h = jnp.concatenate([f1, f2], axis=-1)
    ws = params[0::2]
    bs = params[1::2]
    # object_fc: Linear+ReLU x3, then Linear (no ReLU)
    for i in range(3):
        h = jnp.maximum(h @ ws[i] + bs[i], 0.0)
    h = h @ ws[3] + bs[3]
    # relation_fc: Linear+ReLU x2, then Linear (no ReLU)
    for i in range(4, 6):
        h = jnp.maximum(h @ ws[i] + bs[i], 0.0)
    h = h @ ws[6] + bs[6]
    return h, relations[: edge_index.shape[1]]


if __name__ == "__main__":
    num_relation_classes = 5
    num_objects = 6
    num_edges = 8

    root = jax.random.PRNGKey(0)
    k_feat, k_edge, k_lab, k_param = jax.random.split(root, 4)

    # data.x: per-object features, dim 8 (two concatenated -> 16 = object_fc input)
    object_features = jax.random.normal(k_feat, (num_objects, 8), jnp.float32)
    # data.edge_index: [2, E] object index pairs
    edge_index = jax.random.randint(k_edge, (2, num_edges), 0, num_objects, jnp.int32)
    # data.y: relation labels, one per edge
    relations = jax.random.randint(k_lab, (num_edges,), 0, num_relation_classes, jnp.int32)

    params = make_params(k_param, num_relation_classes)

    fwd = jax.jit(scene_graph_forward,
                  static_argnames=("num_relation_classes", "tile_e"))
    outs, labels = fwd(object_features, relations, edge_index, params,
                       num_relation_classes=num_relation_classes)
    outs = jax.block_until_ready(outs)
    labels = jax.block_until_ready(labels)

    ref_outs, ref_labels = reference_forward(object_features, relations, edge_index, params)
    assert outs.shape == (num_edges, num_relation_classes)
    assert labels.shape == (num_edges,)
    # bf16 MXU operands -> compare against f32 reference with a looser tolerance.
    assert jnp.allclose(outs, ref_outs, atol=2e-2, rtol=2e-2)
    assert jnp.array_equal(labels, ref_labels)

    print("KERNEL_OK")
</pallas_src>

<mosaic_0001>
module attributes {stable_mosaic.version = 11 : i64} {
  func.func @scene_graph_mlp_kernel(%arg0: i32, %arg1: memref<8x2xi32, #tpu.memory_space<vmem>>, %arg2: memref<8x128xbf16, #tpu.memory_space<vmem>>, %arg3: memref<8x128xbf16, #tpu.memory_space<vmem>>, %arg4: memref<1x128xf32, #tpu.memory_space<vmem>>, %arg5: memref<128x64xbf16, #tpu.memory_space<vmem>>, %arg6: memref<1x64xf32, #tpu.memory_space<vmem>>, %arg7: memref<64x32xbf16, #tpu.memory_space<vmem>>, %arg8: memref<1x32xf32, #tpu.memory_space<vmem>>, %arg9: memref<32x8xbf16, #tpu.memory_space<vmem>>, %arg10: memref<1x8xf32, #tpu.memory_space<vmem>>, %arg11: memref<8x4xbf16, #tpu.memory_space<vmem>>, %arg12: memref<1x4xf32, #tpu.memory_space<vmem>>, %arg13: memref<4x8xbf16, #tpu.memory_space<vmem>>, %arg14: memref<1x8xf32, #tpu.memory_space<vmem>>, %arg15: memref<8x8xf32, #tpu.memory_space<vmem>>) attributes {dimension_semantics = [#tpu.dimension_semantics<parallel>], iteration_bounds = array<i64: 1>, scalar_prefetch = 0 : i64, scratch_operands = 0 : i64, tpu.core_type = #tpu.core_type<tc>, window_params = [{transform_indices = @transform_0, window_bounds = array<i64: 8, 2>}, {pipeline_mode = #tpu.pipeline_mode<synchronous>, transform_indices = @transform_1, window_bounds = array<i64: 8, 128>}, {pipeline_mode = #tpu.pipeline_mode<synchronous>, transform_indices = @transform_2, window_bounds = array<i64: 8, 128>}, {pipeline_mode = #tpu.pipeline_mode<synchronous>, transform_indices = @transform_3, window_bounds = array<i64: 1, 128>}, {pipeline_mode = #tpu.pipeline_mode<synchronous>, transform_indices = @transform_4, window_bounds = array<i64: 128, 64>}, {pipeline_mode = #tpu.pipeline_mode<synchronous>, transform_indices = @transform_5, window_bounds = array<i64: 1, 64>}, {pipeline_mode = #tpu.pipeline_mode<synchronous>, transform_indices = @transform_6, window_bounds = array<i64: 64, 32>}, {pipeline_mode = #tpu.pipeline_mode<synchronous>, transform_indices = @transform_7, window_bounds = array<i64: 1, 32>}, {pipeline_mode = #tpu.pipeline_mode<synchronous>, transform_indices = @transform_8, window_bounds = array<i64: 32, 8>}, {pipeline_mode = #tpu.pipeline_mode<synchronous>, transform_indices = @transform_9, window_bounds = array<i64: 1, 8>}, {pipeline_mode = #tpu.pipeline_mode<synchronous>, transform_indices = @transform_10, window_bounds = array<i64: 8, 4>}, {pipeline_mode = #tpu.pipeline_mode<synchronous>, transform_indices = @transform_11, window_bounds = array<i64: 1, 4>}, {pipeline_mode = #tpu.pipeline_mode<synchronous>, transform_indices = @transform_12, window_bounds = array<i64: 4, 8>}, {pipeline_mode = #tpu.pipeline_mode<synchronous>, transform_indices = @transform_13, window_bounds = array<i64: 1, 8>}, {transform_indices = @transform_14, window_bounds = array<i64: 8, 8>}]} {
    %c0 = arith.constant 0 : index
    %c0_0 = arith.constant 0 : index
    %0 = vector.load %arg1[%c0, %c0_0] : memref<8x2xi32, #tpu.memory_space<vmem>>, vector<8x2xi32>
    %1 = tpu.iota {dimensions = array<i32: 1>} : vector<8x8xi32>
    %2 = vector.extract_strided_slice %0 {offsets = [0, 0], sizes = [8, 1], strides = [1, 1]} : vector<8x2xi32> to vector<8x1xi32>
    %3 = vector.broadcast %2 : vector<8x1xi32> to vector<8x8xi32>
    %4 = arith.cmpi eq, %3, %1 : vector<8x8xi32>
    %cst = arith.constant 1.000000e+00 : f32
    %cst_1 = arith.constant 0.000000e+00 : f32
    %5 = vector.broadcast %cst : f32 to vector<8x8xf32>
    %6 = vector.broadcast %cst_1 : f32 to vector<8x8xf32>
    %7 = arith.select %4, %5, %6 : vector<8x8xi1>, vector<8x8xf32>
    %8 = arith.truncf %7 : vector<8x8xf32> to vector<8x8xbf16>
    %9 = vector.extract_strided_slice %0 {offsets = [0, 1], sizes = [8, 1], strides = [1, 1]} : vector<8x2xi32> to vector<8x1xi32>
    %10 = vector.broadcast %9 : vector<8x1xi32> to vector<8x8xi32>
    %11 = arith.cmpi eq, %10, %1 : vector<8x8xi32>
    %cst_2 = arith.constant 1.000000e+00 : f32
    %cst_3 = arith.constant 0.000000e+00 : f32
    %12 = vector.broadcast %cst_2 : f32 to vector<8x8xf32>
    %13 = vector.broadcast %cst_3 : f32 to vector<8x8xf32>
    %14 = arith.select %11, %12, %13 : vector<8x8xi1>, vector<8x8xf32>
    %15 = arith.truncf %14 : vector<8x8xf32> to vector<8x8xbf16>
    %c0_4 = arith.constant 0 : index
    %c0_5 = arith.constant 0 : index
    %16 = vector.load %arg2[%c0_4, %c0_5] : memref<8x128xbf16, #tpu.memory_space<vmem>>, vector<8x128xbf16>
    %cst_6 = arith.constant dense<0.000000e+00> : vector<8x128xf32>
    %17 = tpu.matmul %8, %16, %cst_6 {dimension_numbers = #tpu.dot_dimension_numbers<[1], [0], [0], [1], [0, 0, 1, 1], [], []>} : vector<8x8xbf16>, vector<8x128xbf16>, vector<8x128xf32> -> vector<8x128xf32>
    %c0_7 = arith.constant 0 : index
    %c0_8 = arith.constant 0 : index
    %18 = vector.load %arg3[%c0_7, %c0_8] : memref<8x128xbf16, #tpu.memory_space<vmem>>, vector<8x128xbf16>
    %cst_9 = arith.constant dense<0.000000e+00> : vector<8x128xf32>
    %19 = tpu.matmul %15, %18, %cst_9 {dimension_numbers = #tpu.dot_dimension_numbers<[1], [0], [0], [1], [0, 0, 1, 1], [], []>} : vector<8x8xbf16>, vector<8x128xbf16>, vector<8x128xf32> -> vector<8x128xf32>
    %20 = arith.addf %17, %19 : vector<8x128xf32>
    %c0_10 = arith.constant 0 : index
    %c0_11 = arith.constant 0 : index
    %21 = vector.load %arg4[%c0_10, %c0_11] : memref<1x128xf32, #tpu.memory_space<vmem>>, vector<1x128xf32>
    %22 = vector.broadcast %21 : vector<1x128xf32> to vector<8x128xf32>
    %23 = arith.addf %20, %22 : vector<8x128xf32>
    %cst_12 = arith.constant 0.000000e+00 : f32
    %24 = vector.broadcast %cst_12 : f32 to vector<8x128xf32>
    %25 = arith.maximumf %23, %24 : vector<8x128xf32>
    %26 = arith.truncf %25 : vector<8x128xf32> to vector<8x128xbf16>
    %c0_13 = arith.constant 0 : index
    %c0_14 = arith.constant 0 : index
    %27 = vector.load %arg5[%c0_13, %c0_14] : memref<128x64xbf16, #tpu.memory_space<vmem>>, vector<128x64xbf16>
    %cst_15 = arith.constant dense<0.000000e+00> : vector<8x64xf32>
    %28 = tpu.matmul %26, %27, %cst_15 {dimension_numbers = #tpu.dot_dimension_numbers<[1], [0], [0], [1], [0, 0, 1, 1], [], []>} : vector<8x128xbf16>, vector<128x64xbf16>, vector<8x64xf32> -> vector<8x64xf32>
    %c0_16 = arith.constant 0 : index
    %c0_17 = arith.constant 0 : index
    %29 = vector.load %arg6[%c0_16, %c0_17] : memref<1x64xf32, #tpu.memory_space<vmem>>, vector<1x64xf32>
    %30 = vector.broadcast %29 : vector<1x64xf32> to vector<8x64xf32>
    %31 = arith.addf %28, %30 : vector<8x64xf32>
    %cst_18 = arith.constant 0.000000e+00 : f32
    %32 = vector.broadcast %cst_18 : f32 to vector<8x64xf32>
    %33 = arith.maximumf %31, %32 : vector<8x64xf32>
    %34 = arith.truncf %33 : vector<8x64xf32> to vector<8x64xbf16>
    %c0_19 = arith.constant 0 : index
    %c0_20 = arith.constant 0 : index
    %35 = vector.load %arg7[%c0_19, %c0_20] : memref<64x32xbf16, #tpu.memory_space<vmem>>, vector<64x32xbf16>
    %cst_21 = arith.constant dense<0.000000e+00> : vector<8x32xf32>
    %36 = tpu.matmul %34, %35, %cst_21 {dimension_numbers = #tpu.dot_dimension_numbers<[1], [0], [0], [1], [0, 0, 1, 1], [], []>} : vector<8x64xbf16>, vector<64x32xbf16>, vector<8x32xf32> -> vector<8x32xf32>
    %c0_22 = arith.constant 0 : index
    %c0_23 = arith.constant 0 : index
    %37 = vector.load %arg8[%c0_22, %c0_23] : memref<1x32xf32, #tpu.memory_space<vmem>>, vector<1x32xf32>
    %38 = vector.broadcast %37 : vector<1x32xf32> to vector<8x32xf32>
    %39 = arith.addf %36, %38 : vector<8x32xf32>
    %cst_24 = arith.constant 0.000000e+00 : f32
    %40 = vector.broadcast %cst_24 : f32 to vector<8x32xf32>
    %41 = arith.maximumf %39, %40 : vector<8x32xf32>
    %42 = arith.truncf %41 : vector<8x32xf32> to vector<8x32xbf16>
    %c0_25 = arith.constant 0 : index
    %c0_26 = arith.constant 0 : index
    %43 = vector.load %arg9[%c0_25, %c0_26] : memref<32x8xbf16, #tpu.memory_space<vmem>>, vector<32x8xbf16>
    %cst_27 = arith.constant dense<0.000000e+00> : vector<8x8xf32>
    %44 = tpu.matmul %42, %43, %cst_27 {dimension_numbers = #tpu.dot_dimension_numbers<[1], [0], [0], [1], [0, 0, 1, 1], [], []>} : vector<8x32xbf16>, vector<32x8xbf16>, vector<8x8xf32> -> vector<8x8xf32>
    %c0_28 = arith.constant 0 : index
    %c0_29 = arith.constant 0 : index
    %45 = vector.load %arg10[%c0_28, %c0_29] : memref<1x8xf32, #tpu.memory_space<vmem>>, vector<1x8xf32>
    %46 = vector.broadcast %45 : vector<1x8xf32> to vector<8x8xf32>
    %47 = arith.addf %44, %46 : vector<8x8xf32>
    %cst_30 = arith.constant 0.000000e+00 : f32
    %48 = vector.broadcast %cst_30 : f32 to vector<8x8xf32>
    %49 = arith.maximumf %47, %48 : vector<8x8xf32>
    %50 = arith.truncf %49 : vector<8x8xf32> to vector<8x8xbf16>
    %c0_31 = arith.constant 0 : index
    %c0_32 = arith.constant 0 : index
    %51 = vector.load %arg11[%c0_31, %c0_32] : memref<8x4xbf16, #tpu.memory_space<vmem>>, vector<8x4xbf16>
    %cst_33 = arith.constant dense<0.000000e+00> : vector<8x4xf32>
    %52 = tpu.matmul %50, %51, %cst_33 {dimension_numbers = #tpu.dot_dimension_numbers<[1], [0], [0], [1], [0, 0, 1, 1], [], []>} : vector<8x8xbf16>, vector<8x4xbf16>, vector<8x4xf32> -> vector<8x4xf32>
    %c0_34 = arith.constant 0 : index
    %c0_35 = arith.constant 0 : index
    %53 = vector.load %arg12[%c0_34, %c0_35] : memref<1x4xf32, #tpu.memory_space<vmem>>, vector<1x4xf32>
    %54 = vector.broadcast %53 : vector<1x4xf32> to vector<8x4xf32>
    %55 = arith.addf %52, %54 : vector<8x4xf32>
    %cst_36 = arith.constant 0.000000e+00 : f32
    %56 = vector.broadcast %cst_36 : f32 to vector<8x4xf32>
    %57 = arith.maximumf %55, %56 : vector<8x4xf32>
    %58 = arith.truncf %57 : vector<8x4xf32> to vector<8x4xbf16>
    %c0_37 = arith.constant 0 : index
    %c0_38 = arith.constant 0 : index
    %59 = vector.load %arg13[%c0_37, %c0_38] : memref<4x8xbf16, #tpu.memory_space<vmem>>, vector<4x8xbf16>
    %cst_39 = arith.constant dense<0.000000e+00> : vector<8x8xf32>
    %60 = tpu.matmul %58, %59, %cst_39 {dimension_numbers = #tpu.dot_dimension_numbers<[1], [0], [0], [1], [0, 0, 1, 1], [], []>} : vector<8x4xbf16>, vector<4x8xbf16>, vector<8x8xf32> -> vector<8x8xf32>
    %c0_40 = arith.constant 0 : index
    %c0_41 = arith.constant 0 : index
    %61 = vector.load %arg14[%c0_40, %c0_41] : memref<1x8xf32, #tpu.memory_space<vmem>>, vector<1x8xf32>
    %62 = vector.broadcast %61 : vector<1x8xf32> to vector<8x8xf32>
    %63 = arith.addf %60, %62 : vector<8x8xf32>
    %c0_42 = arith.constant 0 : index
    %c0_43 = arith.constant 0 : index
    %64 = vector.load %arg15[%c0_42, %c0_43] : memref<8x8xf32, #tpu.memory_space<vmem>>, vector<8x8xf32>
    tpu.vector_store %arg15[%c0_42, %c0_43], %63 {strides = array<i32>} : memref<8x8xf32, #tpu.memory_space<vmem>>, vector<8x8xf32>,
    return
  }
  func.func @transform_0(%arg0: i32) -> (i32, i32) {
    %c0_i32 = arith.constant 0 : i32
    %c0_i32_0 = arith.constant 0 : i32
    return %arg0, %c0_i32 : i32, i32
  }
  func.func @transform_1(%arg0: i32) -> (i32, i32) {
    %c0_i32 = arith.constant 0 : i32
    %c0_i32_0 = arith.constant 0 : i32
    %c0_i32_1 = arith.constant 0 : i32
    return %c0_i32, %c0_i32_0 : i32, i32
  }
  func.func @transform_2(%arg0: i32) -> (i32, i32) {
    %c0_i32 = arith.constant 0 : i32
    %c0_i32_0 = arith.constant 0 : i32
    %c0_i32_1 = arith.constant 0 : i32
    return %c0_i32, %c0_i32_0 : i32, i32
  }
  func.func @transform_3(%arg0: i32) -> (i32, i32) {
    %c0_i32 = arith.constant 0 : i32
    %c0_i32_0 = arith.constant 0 : i32
    %c0_i32_1 = arith.constant 0 : i32
    return %c0_i32, %c0_i32_0 : i32, i32
  }
  func.func @transform_4(%arg0: i32) -> (i32, i32) {
    %c0_i32 = arith.constant 0 : i32
    %c0_i32_0 = arith.constant 0 : i32
    %c0_i32_1 = arith.constant 0 : i32
    return %c0_i32, %c0_i32_0 : i32, i32
  }
  func.func @transform_5(%arg0: i32) -> (i32, i32) {
    %c0_i32 = arith.constant 0 : i32
    %c0_i32_0 = arith.constant 0 : i32
    %c0_i32_1 = arith.constant 0 : i32
    return %c0_i32, %c0_i32_0 : i32, i32
  }
  func.func @transform_6(%arg0: i32) -> (i32, i32) {
    %c0_i32 = arith.constant 0 : i32
    %c0_i32_0 = arith.constant 0 : i32
    %c0_i32_1 = arith.constant 0 : i32
    return %c0_i32, %c0_i32_0 : i32, i32
  }
  func.func @transform_7(%arg0: i32) -> (i32, i32) {
    %c0_i32 = arith.constant 0 : i32
    %c0_i32_0 = arith.constant 0 : i32
    %c0_i32_1 = arith.constant 0 : i32
    return %c0_i32, %c0_i32_0 : i32, i32
  }
  func.func @transform_8(%arg0: i32) -> (i32, i32) {
    %c0_i32 = arith.constant 0 : i32
    %c0_i32_0 = arith.constant 0 : i32
    %c0_i32_1 = arith.constant 0 : i32
    return %c0_i32, %c0_i32_0 : i32, i32
  }
  func.func @transform_9(%arg0: i32) -> (i32, i32) {
    %c0_i32 = arith.constant 0 : i32
    %c0_i32_0 = arith.constant 0 : i32
    %c0_i32_1 = arith.constant 0 : i32
    return %c0_i32, %c0_i32_0 : i32, i32
  }
  func.func @transform_10(%arg0: i32) -> (i32, i32) {
    %c0_i32 = arith.constant 0 : i32
    %c0_i32_0 = arith.constant 0 : i32
    %c0_i32_1 = arith.constant 0 : i32
    return %c0_i32, %c0_i32_0 : i32, i32
  }
  func.func @transform_11(%arg0: i32) -> (i32, i32) {
    %c0_i32 = arith.constant 0 : i32
    %c0_i32_0 = arith.constant 0 : i32
    %c0_i32_1 = arith.constant 0 : i32
    return %c0_i32, %c0_i32_0 : i32, i32
  }
  func.func @transform_12(%arg0: i32) -> (i32, i32) {
    %c0_i32 = arith.constant 0 : i32
    %c0_i32_0 = arith.constant 0 : i32
    %c0_i32_1 = arith.constant 0 : i32
    return %c0_i32, %c0_i32_0 : i32, i32
  }
  func.func @transform_13(%arg0: i32) -> (i32, i32) {
    %c0_i32 = arith.constant 0 : i32
    %c0_i32_0 = arith.constant 0 : i32
    %c0_i32_1 = arith.constant 0 : i32
    return %c0_i32, %c0_i32_0 : i32, i32
  }
  func.func @transform_14(%arg0: i32) -> (i32, i32) {
    %c0_i32 = arith.constant 0 : i32
    %c0_i32_0 = arith.constant 0 : i32
    return %arg0, %c0_i32 : i32, i32
  }
}

</mosaic_0001>

<bundles_post_ra>
// kernel: scene_graph_forward.1
= control target key start
LH: loop header
LB: loop body
LE: loop exit
PB: predicated region body
PF: predicated region fallthrough
CT: control target
= control target key end

     0   :  { %v473_v1 = vmov 0   ;;  %s637_s0 = inlined_call_operand.vmem [shape: s32[8,2], index: 0, kind: input, shape index: {}]   ;;  %s638_s1 = inlined_call_operand.vmem [shape: bf16[8,128], index: 1, kind: input, shape index: {}]   ;;  %s639_s2 = inlined_call_operand.vmem [shape: bf16[8,128], index: 2, kind: input, shape index: {}]   ;;  %s640_s3 = inlined_call_operand.vmem [shape: f32[1,128], index: 3, kind: input, shape index: {}]   ;;  %s641_s4 = inlined_call_operand.vmem [shape: bf16[128,64], index: 4, kind: input, shape index: {}]   ;;  %s642_s5 = inlined_call_operand.vmem [shape: f32[1,64], index: 5, kind: input, shape index: {}]   ;;  %s643_s6 = inlined_call_operand.vmem [shape: bf16[64,32], index: 6, kind: input, shape index: {}]   ;;  %s644_s7 = inlined_call_operand.vmem [shape: f32[1,32], index: 7, kind: input, shape index: {}]   ;;  %s645_s8 = inlined_call_operand.vmem [shape: bf16[32,8], index: 8, kind: input, shape index: {}]   ;;  %s646_s9 = inlined_call_operand.vmem [shape: f32[1,8], index: 9, kind: input, shape index: {}]   ;;  %s647_s10 = inlined_call_operand.vmem [shape: bf16[8,4], index: 10, kind: input, shape index: {}]   ;;  %s648_s11 = inlined_call_operand.vmem [shape: f32[1,4], index: 11, kind: input, shape index: {}]   ;;  %s649_s12 = inlined_call_operand.vmem [shape: bf16[4,8], index: 12, kind: input, shape index: {}]   ;;  %s650_s13 = inlined_call_operand.vmem [shape: f32[1,8], index: 13, kind: input, shape index: {}]   ;;  %s651_s14 = inlined_call_operand.hbm [shape: f32[8,8], index: 14, kind: output, shape index: {}]  }
   0x1   :  { %v49_v0 = vld [vmem:[%s637_s0] sm:$0xff]  ;;  %439 = vset.pattern.permute.xlu0 %v473_v1 }
   0x2   :  { %53 = vperm.xlu0 %439, %v49_v0  }
   0x3   :  { %19 = vsyncpa [#allocation3], 0  ;;  %v474_v2 = vmov 1   ;;  %v64_v3 = vld [vmem:[%s638_s1] sm:$0xf]  ;;  %vm70_vm0 = vcmask 1043456   ;;  %v50_v11 = vlaneseq }
   0x4   :  { %v91_v4 = vsel %vm70_vm0, %v64_v3, 0  ;;  %v65_v5 = vld [vmem:[%s639_s2] sm:$0xf]  ;;  %v428_v7 = vld [vmem:[%s641_s4 + $0x38] sm:$0xff]  ;;  %v427_v8 = vld [vmem:[%s641_s4 + $0x30] sm:$0xff]  ;;  %v475_v14 = vmov 0.0  }
   0x5   :  { %100 = vmatpush.bf16.msra.mxu1 %v91_v4  ;;  %v72_v6 = vsel %vm70_vm0, %v65_v5, 0  ;;  %181 = vmatpush.bf16.msra.mxu2 %v428_v7  ;;  %v426_v9 = vld [vmem:[%s641_s4 + $0x28] sm:$0xff]  ;;  %v425_v10 = vld [vmem:[%s641_s4 + $0x20] sm:$0xff]  ;;  %v51_v12 = vand.u32 127, %v50_v11  ;;  %vm66_vm2 = vcmask 64512   ;;  %v424_v20 = vld [vmem:[%s641_s4 + $0x18] sm:$0xff] }
   0x6   :  { %81 = vmatpush.bf16.msra.mxu0 %v72_v6  ;;  %v423_v21 = vld [vmem:[%s641_s4 + $0x10] sm:$0xff]  ;;  %v422_v22 = vld [vmem:[%s641_s4 + $0x8] sm:$0xff]  ;;  %v421_v23 = vld [vmem:[%s641_s4] sm:$0xff]  ;;  %vm232_vm4 = vcmask 523264   ;;  %vm271_vm5 = vcmask 261120   ;;  %vm325_vm6 = vcmask 1041408  }
   0x7   :  { %v432_v24 = vld [vmem:[%s643_s6 + $0x18] sm:$0xff]  ;;  %v431_v25 = vld [vmem:[%s643_s6 + $0x10] sm:$0xff]  ;;  %v441_v28 = vld [vmem:[%s640_s3] ss:$0 sm:$0xff]  ;;  %vm321_vm7 = vcmask 31744   ;;  %s476_s16 = smov [#allocation2]  }
   0x8   :  { %240 = vmatpush.bf16.msra.mxu3 %v432_v24  ;;  %v430_v35 = vld [vmem:[%s643_s6 + $0x8] sm:$0xff]  ;;  %v429_v36 = vld [vmem:[%s643_s6] sm:$0xff]  ;;  %s348_s17 = sshll.u32 %s476_s16, 4  ;;  %s350_s19 = sshll.u32 %s651_s14, 4  ;;  %s349_s17 = int_to_ptr.vmem [resolvable:$true] %s348_s17  ;;  %s351_s19 = int_to_ptr.hbm [resolvable:$true] %s350_s19 }
   0x9   :  { %182 = vmatpush.bf16.msra.mxu2 %v427_v8  ;;  %v434_v37 = vld [vmem:[%s645_s8 + $0x8] sm:$0xff]  ;;  %v433_v38 = vld [vmem:[%s645_s8] sm:$0xff] }
   0xa   :  { %440 = vset.pattern.permute.xlu0 %v474_v2  ;;  %281 = vmatpush.bf16.msrb.mxu0 %v434_v37  ;;  %v442_v39 = vld [vmem:[%s642_s5] ss:$0 sm:$0xff] }
   0xb   :  { %59 = vperm.xlu0 %440, %v49_v0   ;;  %v290_v45 = vld [vmem:[%s647_s10] sm:$0xf] }
   0xc   :  { %241 = vmatpush.bf16.msra.mxu3 %v431_v25  ;;  %v299_v46 = vsel %vm70_vm0, %v290_v45, 0  ;;  %v443_v47 = vld [vmem:[%s644_s7] ss:$0 sm:$0xff] }
   0xd   :  { %183 = vmatpush.bf16.msra.mxu2 %v426_v9  ;;  %308 = vmatpush.bf16.msrb.mxu1 %v299_v46  ;;  %v316_v53 = vld [vmem:[%s649_s12] sm:$0x3] }
   0xe   :  { %282 = vmatpush.bf16.msrb.mxu0 %v433_v38  ;;  %v327_v54 = vsel %vm325_vm6, %v316_v53, 0  ;;  %v444_v55 = vld [vmem:[%s646_s9] ss:$0 sm:$0xff] }
   0xf   :  { %v445_v61 = vld [vmem:[%s648_s11] ss:$0 sm:$0xff] }
  0x10   :  { %242 = vmatpush.bf16.msra.mxu3 %v430_v35  ;;  %v446_v3 = vld [vmem:[%s650_s13] ss:$0 sm:$0xff] }
  0x11   :  { %184 = vmatpush.bf16.msra.mxu2 %v425_v10 }
  0x14   :  { %243 = vmatpush.bf16.msra.mxu3 %v429_v36 }
  0x15   :  { %185 = vmatpush.bf16.msra.mxu2 %v424_v20 }
  0x18   :  { %336 = vmatpush.bf16.msrb.mxu3 %v327_v54 }
  0x19   :  { %186 = vmatpush.bf16.msra.mxu2 %v423_v21 }
  0x1d   :  { %187 = vmatpush.bf16.msra.mxu2 %v422_v22 }
  0x21   :  { %188 = vmatpush.bf16.msra.mxu2 %v421_v23 }
  0x74   :  { %v54_v13 = vpop.permute.xlu0 %53 }
  0x75   :  { %vm55_vm1 = vcmp.eq.s32.totalorder %v54_v13, %v51_v12 }
  0x76   :  { %v56_v15 = vsel %vm55_vm1, 1.0, %v475_v14 }
  0x77   :  { %v57_v16 = vpack.c.bf16 %v56_v15, %v56_v15 }
  0x79   :  { %360 = vmatmul.msk.bf16.vlgmr.msra.gmra.mxu1 %vm66_vm2, %v57_v16 }
  0x7d   :  { %v60_v17 = vpop.permute.xlu0 %59 }
  0x7e   :  { %vm61_vm3 = vcmp.eq.s32.totalorder %v60_v17, %v51_v12 }
  0x7f   :  { %v62_v18 = vsel %vm61_vm3, 1.0, %v475_v14 }
  0x80   :  { %v63_v19 = vpack.c.bf16 %v62_v18, %v62_v18 }
  0x82   :  { %359 = vmatmul.msk.bf16.vlgmr.msra.gmra.mxu0 %vm66_vm2, %v63_v19 }
  0xf6   :  { %v102_v26 = vpop.f32.mrf.mxu1 }
  0xfe   :  { %v104_v27 = vpop.f32.mrf.mxu1 }
  0xff   :  { %v83_v29 = vpop.f32.mrf.mxu0 }
 0x100   :  { %v103_v30 = vadd.f32 %v102_v26, %v83_v29 }
 0x102   :  { %v110_v31 = vadd.f32 %v441_v28, %v103_v30 }
 0x104   :  { %v111_v32 = vmax.f32 %v110_v31, 0.0 }
 0x106   :  { %v112_v33 = vpack.c.bf16 %v111_v32, %v111_v32 }
 0x107   :  { %v85_v34 = vpop.f32.mrf.mxu0 }
 0x108   :  { %189 = vmatmul.bf16.vlgmr.msra.gmra.mxu2 %v112_v33 }
 0x18b   :  { %v190_v40 = vpop.f32.mrf.mxu2 }
 0x18c   :  { %v191_v41 = vadd.f32 %v442_v39, %v190_v40 }
 0x18e   :  { %v194_v42 = vmax.f32 %v191_v41, 0.0 }
 0x190   :  { %v195_v43 = vpack.c.bf16 %v194_v42, %v194_v42 }
 0x192   :  { %409 = vmatmul.msk.bf16.vlgmr.msra.gmra.mxu3 %vm232_vm4, %v195_v43 }
 0x193   :  { %v192_v44 = vpop.f32.mrf.mxu2 }
 0x215   :  { %v245_v48 = vpop.f32.mrf.mxu3 }
 0x216   :  { %v246_v49 = vadd.f32 %v443_v47, %v245_v48 }
 0x218   :  { %v249_v50 = vmax.f32 %v246_v49, 0.0 }
 0x21a   :  { %v250_v51 = vpack.c.bf16 %v249_v50, %v249_v50 }
 0x21c   :  { %418 = vmatmul.msk.bf16.vlgmr.msrb.gmra.mxu0 %vm271_vm5, %v250_v51 }
 0x21d   :  { %v247_v52 = vpop.f32.mrf.mxu3 }
 0x299   :  { %v284_v56 = vpop.f32.mrf.mxu0 }
 0x29a   :  { %v285_v57 = vadd.f32 %v444_v55, %v284_v56 }
 0x29c   :  { %v288_v58 = vmax.f32 %v285_v57, 0.0 }
 0x29e   :  { %v289_v59 = vpack.c.bf16 %v288_v58, %v288_v58 }
 0x2a0   :  { %419 = vmatmul.msk.bf16.vlgmr.msrb.gmra.mxu1 %vm66_vm2, %v289_v59 }
 0x2a1   :  { %v286_v60 = vpop.f32.mrf.mxu0 }
 0x31d   :  { %v310_v62 = vpop.f32.mrf.mxu1 }
 0x31e   :  { %v311_v63 = vadd.f32 %v445_v61, %v310_v62 }
 0x320   :  { %v314_v0 = vmax.f32 %v311_v63, 0.0 }
 0x322   :  { %v315_v1 = vpack.c.bf16 %v314_v0, %v314_v0 }
 0x324   :  { %420 = vmatmul.msk.bf16.vlgmr.msrb.gmra.mxu3 %vm321_vm7, %v315_v1 }
 0x325   :  { %v312_v2 = vpop.f32.mrf.mxu1 }
 0x3a7   :  { %v338_v4 = vpop.f32.mrf.mxu3 }
 0x3a8   :  { %v339_v5 = vadd.f32 %v446_v3, %v338_v4 }
 0x3aa   :  { %342 = vst.msk [vmem:[#allocation2] sm:$0xff] %vm66_vm2, %v339_v5 }
 0x3ab   :  { %353 = dma.vmem_to_hbm [thread:$0]  %s349_s17, 128, %s351_s19, [#allocation3]  }
 0x3af   :  { %v340_v6 = vpop.f32.mrf.mxu3 }
 0x3b0   :  { %471 = dma.done.wait [#allocation3], 128  }
 0x3b1   :  { %472 = vsyncadd [#allocation3], 4294967168 }
 0x3b2   :  { %358 = vsyncpa [#allocation3], 1 }

</bundles_post_ra>
